<compile_context>
chip_gen: v6e
topology: v6e:2x2x1
jax: 0.10.0
libtpu: 0.0.40
codegen_flags: <defaults>
</compile_context>

<pallas_src>
import functools

import jax
import jax.numpy as jnp
from jax.experimental import pallas as pl
from jax.experimental.pallas import tpu as pltpu


def _sprm_loss_kernel(*refs, strategy, do_neg, slope, b, tm, use_qsim):
    if use_qsim:
        pred_ref, qsim_ref, tgt_ref, out_ref, acc0, acc1, acc2 = refs
    else:
        pred_ref, tgt_ref, out_ref, acc0, acc1, acc2 = refs
        qsim_ref = None

    i = pl.program_id(0)

    @pl.when(i == 0)
    def _init():
        acc0[...] = jnp.zeros_like(acc0)
        acc1[...] = jnp.zeros_like(acc1)
        acc2[...] = jnp.zeros_like(acc2)

    pred = pred_ref[...].astype(jnp.float32)                      # (tm, b)
    tgt = tgt_ref[...]                                            # (tm, 1) int32

    col = jax.lax.broadcasted_iota(jnp.int32, (tm, b), 1)         # (tm, b)
    row_g = i * tm + jax.lax.broadcasted_iota(jnp.int32, (tm, 1), 0)  # global row id
    valid = row_g < b                                             # (tm, 1) bool
    eye = col == row_g                                            # global diagonal

    if use_qsim:
        # query_weight = sigmoid(-query_similarity * slope)
        qw = jax.nn.sigmoid(-qsim_ref[...].astype(jnp.float32) * slope)
    else:
        qw = None  # statically unused below

    # pos_pred[r] = predictions[r, target[r]]   (torch.gather along dim 1)
    pos_onehot = col == tgt
    pos_pred = jnp.sum(jnp.where(pos_onehot, pred, 0.0), axis=-1, keepdims=True)

    if strategy == "ce":
        # per-row cross entropy, reduction='none'
        m = jnp.max(pred, axis=-1, keepdims=True)
        lse = m + jnp.log(jnp.sum(jnp.exp(pred - m), axis=-1, keepdims=True))
        ce = lse - pos_pred                                       # (tm, 1)
        if do_neg:
            # sum(qw + eye, -1) == sum(qw, -1) + 1
            neg_w = jnp.sum(qw, axis=-1, keepdims=True) + 1.0
        else:
            neg_w = jnp.full_like(ce, float(b) + 1.0)
        acc0[...] += jnp.sum(jnp.where(valid, ce * neg_w, 0.0), keepdims=True)
        acc1[...] += jnp.sum(jnp.where(valid, neg_w, 0.0), keepdims=True)

    elif strategy == "negN":
        if do_neg:
            neg_qw = jnp.where(eye, 0.0, qw)                      # one masked temp
            neg_qw_sum = jnp.sum(neg_qw, axis=-1, keepdims=True)
            neg_pw_sum = jnp.sum(pred * neg_qw, axis=-1, keepdims=True)
        else:
            neg_qw_sum = jnp.full_like(pos_pred, float(b) - 1.0)
            neg_pw_sum = jnp.sum(jnp.where(eye, 0.0, pred), axis=-1, keepdims=True)
        neg_pred = neg_pw_sum / neg_qw_sum                        # (tm, 1)
        acc0[...] += jnp.sum(jnp.where(valid, pos_pred, 0.0), keepdims=True)
        acc1[...] += jnp.sum(jnp.where(valid, neg_pred, 0.0), keepdims=True)

    else:
        # neg1 family: pick one negative index per row, then gather.
        if strategy == "neg1":
            neg_index = (tgt + 1) % b
        elif strategy == "neg1_min":
            # argmax over query_weight with the diagonal masked to 0
            qmask = jnp.where(eye, 0.0, qw)
            mx = jnp.max(qmask, axis=-1, keepdims=True)
            cand = jnp.where(qmask == mx, col, b)
            neg_index = jnp.min(cand, axis=-1, keepdims=True)
        elif strategy == "neg1_max":
            # argmin over query_weight with the diagonal masked to 1
            qmask = jnp.where(eye, 1.0, qw)
            mn = jnp.min(qmask, axis=-1, keepdims=True)
            cand = jnp.where(qmask == mn, col, b)
            neg_index = jnp.min(cand, axis=-1, keepdims=True)
        else:
            raise ValueError(f"Invalid loss strategy '{strategy}'.")

        neg_onehot = col == neg_index
        # gather pred and qw separately as (tm,1) vectors, multiply afterwards
        # instead of forming pred*qw over the whole (tm, b) tile.
        neg_pred_raw = jnp.sum(jnp.where(neg_onehot, pred, 0.0),
                               axis=-1, keepdims=True)
        if do_neg:
            neg_w = jnp.sum(jnp.where(neg_onehot, qw, 0.0),
                            axis=-1, keepdims=True)
            neg_pred = neg_pred_raw * neg_w
        else:
            neg_w = jnp.ones_like(neg_pred_raw)
            neg_pred = neg_pred_raw
        acc0[...] += jnp.sum(jnp.where(valid, pos_pred, 0.0), keepdims=True)
        acc1[...] += jnp.sum(jnp.where(valid, neg_pred, 0.0), keepdims=True)
        acc2[...] += jnp.sum(jnp.where(valid, neg_w, 0.0), keepdims=True)

    @pl.when(i == pl.num_programs(0) - 1)
    def _finalize():
        if strategy == "ce":
            out_ref[...] = acc0[...] / acc1[...]
        elif strategy == "negN":
            out_ref[...] = (acc1[...] - acc0[...]) * (1.0 / float(b))
        else:
            out_ref[...] = (-acc0[...] * (1.0 / float(b))
                            + acc1[...] / (acc2[...] + 1e-8))


def sprm_loss(predictions, target, query_similarity, *,
              loss_strategy="negN", do_negative_weighting=True,
              loss_sigmoid_slope=1.0, tile_rows=256):
    """Pallas implementation of SPRMLoss.forward (returns a scalar f32 loss).

    predictions / query_similarity may be f32 or bf16; compute is f32.
    tile_rows: row-tile size (use ~256 on v7x, up to 512 on v5e/v6e).
    """
    b = predictions.shape[0]
    do_neg = bool(do_negative_weighting)
    # query_similarity only matters if it weights terms or selects negatives.
    use_qsim = do_neg or loss_strategy in ("neg1_min", "neg1_max")

    tm = min(int(tile_rows), b)
    if tm < b:
        tm = max(8, (tm // 8) * 8)      # (8,128) block rule on the sublane dim
    grid = (pl.cdiv(b, tm),)

    tgt2d = target.astype(jnp.int32).reshape(b, 1)

    inputs = [predictions]
    in_specs = [pl.BlockSpec((tm, b), lambda i: (i, 0))]
    if use_qsim:
        inputs.append(query_similarity)
        in_specs.append(pl.BlockSpec((tm, b), lambda i: (i, 0)))
    inputs.append(tgt2d)
    in_specs.append(pl.BlockSpec((tm, 1), lambda i: (i, 0)))

    kernel = functools.partial(
        _sprm_loss_kernel,
        strategy=loss_strategy, do_neg=do_neg,
        slope=float(loss_sigmoid_slope), b=b, tm=tm, use_qsim=use_qsim)

    # VMEM budget: the big inputs are double-buffered by the pipeline.
    n_big = 1 + int(use_qsim)
    est = n_big * 2 * tm * b * predictions.dtype.itemsize + (2 << 20)
    vmem_limit = int(min(max(est, 16 << 20), 48 << 20))

    out = pl.pallas_call(
        kernel,
        out_shape=jax.ShapeDtypeStruct((1, 1), jnp.float32),
        grid_spec=pltpu.PrefetchScalarGridSpec(
            num_scalar_prefetch=0,
            grid=grid,
            in_specs=in_specs,
            out_specs=pl.BlockSpec((1, 1), lambda i: (0, 0)),
            scratch_shapes=[pltpu.VMEM((1, 1), jnp.float32)] * 3,
        ),
        compiler_params=pltpu.CompilerParams(
            dimension_semantics=("arbitrary",),   # accumulators carried over rows
            vmem_limit_bytes=vmem_limit),
    )(*inputs)
    return out[0, 0]


# ------------------------- pure-JAX reference ------------------------------
def _ref_loss(pred, tgt, qsim, strategy, do_neg, slope):
    pred = pred.astype(jnp.float32)
    qsim = qsim.astype(jnp.float32)
    b = pred.shape[0]
    qw = jax.nn.sigmoid(-qsim * slope)
    eye = jnp.eye(b, dtype=pred.dtype)
    rows = jnp.arange(b)
    pos_pred = pred[rows, tgt]
    if strategy == "ce":
        qe = qw if do_neg else jnp.ones_like(pred)
        ce = -jax.nn.log_softmax(pred, axis=-1)[rows, tgt]
        nw = jnp.sum(qe + eye, axis=-1)
        return jnp.sum(ce * nw) / jnp.sum(nw)
    if strategy == "negN":
        qe = qw if do_neg else jnp.ones_like(pred)
        nqw = qe * (1.0 - eye)
        neg_pred = jnp.sum(pred * nqw, axis=-1) / jnp.sum(nqw, axis=-1)
        return -jnp.mean(pos_pred) + jnp.mean(neg_pred)
    if strategy == "neg1":
        neg_index = (tgt + 1) % b
    elif strategy == "neg1_min":
        neg_index = jnp.argmax(jnp.where(eye == 1.0, 0.0, qw), axis=-1)
    elif strategy == "neg1_max":
        neg_index = jnp.argmin(jnp.where(eye == 1.0, 1.0, qw), axis=-1)
    else:
        raise ValueError(strategy)
    qe = qw if do_neg else jnp.ones_like(pred)
    pred_w = pred * qe
    neg_w = qe[rows, neg_index]
    neg_pred = pred_w[rows, neg_index]
    return -jnp.mean(pos_pred) + jnp.sum(neg_pred) / (jnp.sum(neg_w) + 1e-8)


if __name__ == "__main__":
    slope = 2.0
    strategies = ["neg1", "neg1_min", "neg1_max", "negN", "ce"]
    key = jax.random.PRNGKey(0)

    # Case 1: small single-tile batch.
    # Case 2: multi-tile batch with a partial last tile (exercises row masking
    #         and the cross-tile accumulators): b=40, tile_rows=16 -> 3 tiles.
    for b, tile_rows in ((8, 256), (40, 16)):
        k1, k2, k3, key = jax.random.split(key, 4)
        predictions = jax.random.normal(k1, (b, b), dtype=jnp.float32)
        query_similarity = jax.random.uniform(k2, (b, b), dtype=jnp.float32)
        target = jax.random.randint(k3, (b,), 0, b, dtype=jnp.int32)

        for strat in strategies:
            for do_neg in (True, False):
                got = sprm_loss(predictions, target, query_similarity,
                                loss_strategy=strat,
                                do_negative_weighting=do_neg,
                                loss_sigmoid_slope=slope,
                                tile_rows=tile_rows)
                got = jax.block_until_ready(got)
                want = _ref_loss(predictions, target, query_similarity,
                                 strat, do_neg, slope)
                assert jnp.allclose(got, want, atol=1e-5, rtol=1e-5), (
                    b, strat, do_neg, float(got), float(want))

        # bf16 inputs (no wrapper-side upcast: halves the HBM traffic).
        pred_bf16 = predictions.astype(jnp.bfloat16)
        qsim_bf16 = query_similarity.astype(jnp.bfloat16)
        got = sprm_loss(pred_bf16, target, qsim_bf16,
                        loss_strategy="negN", do_negative_weighting=True,
                        loss_sigmoid_slope=slope, tile_rows=tile_rows)
        got = jax.block_until_ready(got)
        want = _ref_loss(pred_bf16.astype(jnp.float32), target,
                         qsim_bf16.astype(jnp.float32), "negN", True, slope)
        assert jnp.allclose(got, want, atol=1e-4, rtol=1e-4), (
            b, "negN-bf16", float(got), float(want))

    print("KERNEL_OK")
</pallas_src>

<mosaic_0001>
module attributes {stable_mosaic.version = 11 : i64} {
  func.func @_sprm_loss_kernel(%arg0: i32, %arg1: memref<8x8xf32, #tpu.memory_space<vmem>>, %arg2: memref<8x8xf32, #tpu.memory_space<vmem>>, %arg3: memref<8x1xi32, #tpu.memory_space<vmem>>, %arg4: memref<1x1xf32, #tpu.memory_space<vmem>>, %arg5: memref<1x1xf32, #tpu.memory_space<vmem>>, %arg6: memref<1x1xf32, #tpu.memory_space<vmem>>, %arg7: memref<1x1xf32, #tpu.memory_space<vmem>>) attributes {dimension_semantics = [#tpu.dimension_semantics<arbitrary>], iteration_bounds = array<i64: 1>, scalar_prefetch = 0 : i64, scratch_operands = 3 : i64, tpu.core_type = #tpu.core_type<tc>, window_params = [{transform_indices = @transform_0, window_bounds = array<i64: 8, 8>}, {transform_indices = @transform_1, window_bounds = array<i64: 8, 8>}, {transform_indices = @transform_2, window_bounds = array<i64: 8, 1>}, {pipeline_mode = #tpu.pipeline_mode<synchronous>, transform_indices = @transform_3, window_bounds = array<i64: 1, 1>}]} {
    %c0_i32 = arith.constant 0 : i32
    %0 = arith.cmpi eq, %arg0, %c0_i32 : i32
    %1 = arith.extui %0 : i1 to i32
    %c0_i32_0 = arith.constant 0 : i32
    %2 = arith.cmpi ne, %1, %c0_i32_0 : i32
    scf.if %2 {
      %cst_41 = arith.constant 0.000000e+00 : f32
      %90 = vector.broadcast %cst_41 : f32 to vector<1x1xf32>
      %c0_42 = arith.constant 0 : index
      %c0_43 = arith.constant 0 : index
      %91 = vector.load %arg5[%c0_42, %c0_43] : memref<1x1xf32, #tpu.memory_space<vmem>>, vector<1x1xf32>
      tpu.vector_store %arg5[%c0_42, %c0_43], %90 {strides = array<i32>} : memref<1x1xf32, #tpu.memory_space<vmem>>, vector<1x1xf32>,
      %cst_44 = arith.constant 0.000000e+00 : f32
      %92 = vector.broadcast %cst_44 : f32 to vector<1x1xf32>
      %c0_45 = arith.constant 0 : index
      %c0_46 = arith.constant 0 : index
      %93 = vector.load %arg6[%c0_45, %c0_46] : memref<1x1xf32, #tpu.memory_space<vmem>>, vector<1x1xf32>
      tpu.vector_store %arg6[%c0_45, %c0_46], %92 {strides = array<i32>} : memref<1x1xf32, #tpu.memory_space<vmem>>, vector<1x1xf32>,
      %cst_47 = arith.constant 0.000000e+00 : f32
      %94 = vector.broadcast %cst_47 : f32 to vector<1x1xf32>
      %c0_48 = arith.constant 0 : index
      %c0_49 = arith.constant 0 : index
      %95 = vector.load %arg7[%c0_48, %c0_49] : memref<1x1xf32, #tpu.memory_space<vmem>>, vector<1x1xf32>
      tpu.vector_store %arg7[%c0_48, %c0_49], %94 {strides = array<i32>} : memref<1x1xf32, #tpu.memory_space<vmem>>, vector<1x1xf32>,
    } else {
    }
    %c0 = arith.constant 0 : index
    %c0_1 = arith.constant 0 : index
    %3 = vector.load %arg1[%c0, %c0_1] : memref<8x8xf32, #tpu.memory_space<vmem>>, vector<8x8xf32>
    %c0_2 = arith.constant 0 : index
    %c0_3 = arith.constant 0 : index
    %4 = vector.load %arg3[%c0_2, %c0_3] : memref<8x1xi32, #tpu.memory_space<vmem>>, vector<8x1xi32>
    %5 = tpu.iota {dimensions = array<i32: 1>} : vector<8x8xi32>
    %c8_i32 = arith.constant 8 : i32
    %6 = arith.muli %arg0, %c8_i32 : i32
    %7 = tpu.iota {dimensions = array<i32: 0>} : vector<8x1xi32>
    %8 = vector.broadcast %6 : i32 to vector<8x1xi32>
    %9 = arith.addi %8, %7 : vector<8x1xi32>
    %c8_i32_4 = arith.constant 8 : i32
    %10 = vector.broadcast %c8_i32_4 : i32 to vector<8x1xi32>
    %11 = arith.cmpi slt, %9, %10 : vector<8x1xi32>
    %c0_5 = arith.constant 0 : index
    %c0_6 = arith.constant 0 : index
    %12 = vector.load %arg2[%c0_5, %c0_6] : memref<8x8xf32, #tpu.memory_space<vmem>>, vector<8x8xf32>
    %cst = arith.constant 0.000000e+00 : f32
    %13 = vector.broadcast %cst : f32 to vector<8x8xf32>
    %14 = arith.subf %13, %12 : vector<8x8xf32>
    %cst_7 = arith.constant 2.000000e+00 : f32
    %15 = vector.broadcast %cst_7 : f32 to vector<8x8xf32>
    %16 = arith.mulf %14, %15 : vector<8x8xf32>
    %17 = arith.negf %16 : vector<8x8xf32>
    %18 = math.exp %17 : vector<8x8xf32>
    %cst_8 = arith.constant 1.000000e+00 : f32
    %19 = vector.broadcast %cst_8 : f32 to vector<8x8xf32>
    %20 = arith.addf %19, %18 : vector<8x8xf32>
    %21 = arith.divf %19, %20 : vector<8x8xf32>
    %22 = vector.broadcast %4 : vector<8x1xi32> to vector<8x8xi32>
    %23 = arith.cmpi eq, %5, %22 : vector<8x8xi32>
    %cst_9 = arith.constant 0.000000e+00 : f32
    %24 = vector.broadcast %cst_9 : f32 to vector<8x8xf32>
    %25 = arith.select %23, %3, %24 : vector<8x8xi1>, vector<8x8xf32>
    %cst_10 = arith.constant dense<0.000000e+00> : vector<8xf32>
    %26 = vector.multi_reduction <add>, %25, %cst_10 [1] : vector<8x8xf32> to vector<8xf32>
    %27 = vector.shape_cast %26 : vector<8xf32> to vector<8x1xf32>
    %c1_i32 = arith.constant 1 : i32
    %28 = vector.broadcast %c1_i32 : i32 to vector<8x1xi32>
    %29 = arith.addi %4, %28 : vector<8x1xi32>
    %c8_i32_11 = arith.constant 8 : i32
    %c0_i32_12 = arith.constant 0 : i32
    %30 = arith.cmpi eq, %c8_i32_11, %c0_i32_12 : i32
    %c1_i32_13 = arith.constant 1 : i32
    %31 = arith.select %30, %c1_i32_13, %c8_i32_11 : i32
    %32 = vector.broadcast %31 : i32 to vector<8x1xi32>
    %33 = arith.remsi %29, %32 : vector<8x1xi32>
    %c0_i32_14 = arith.constant 0 : i32
    %34 = vector.broadcast %c0_i32_14 : i32 to vector<8x1xi32>
    %35 = arith.cmpi ne, %33, %34 : vector<8x1xi32>
    %c0_i32_15 = arith.constant 0 : i32
    %36 = vector.broadcast %c0_i32_15 : i32 to vector<8x1xi32>
    %37 = arith.cmpi slt, %33, %36 : vector<8x1xi32>
    %c0_i32_16 = arith.constant 0 : i32
    %38 = arith.cmpi slt, %31, %c0_i32_16 : i32
    %39 = vector.broadcast %38 : i1 to vector<8x1xi1>
    %40 = vector.broadcast %39 : vector<8x1xi1> to vector<8x1xi1>
    %41 = arith.xori %37, %40 : vector<8x1xi1>
    %42 = arith.andi %41, %35 : vector<8x1xi1>
    %43 = vector.broadcast %31 : i32 to vector<8x1xi32>
    %44 = arith.addi %33, %43 : vector<8x1xi32>
    %45 = arith.select %42, %44, %33 : vector<8x1xi1>, vector<8x1xi32>
    %46 = vector.broadcast %45 : vector<8x1xi32> to vector<8x8xi32>
    %47 = arith.cmpi eq, %5, %46 : vector<8x8xi32>
    %cst_17 = arith.constant 0.000000e+00 : f32
    %48 = vector.broadcast %cst_17 : f32 to vector<8x8xf32>
    %49 = arith.select %47, %3, %48 : vector<8x8xi1>, vector<8x8xf32>
    %cst_18 = arith.constant dense<0.000000e+00> : vector<8xf32>
    %50 = vector.multi_reduction <add>, %49, %cst_18 [1] : vector<8x8xf32> to vector<8xf32>
    %51 = vector.shape_cast %50 : vector<8xf32> to vector<8x1xf32>
    %cst_19 = arith.constant 0.000000e+00 : f32
    %52 = vector.broadcast %cst_19 : f32 to vector<8x8xf32>
    %53 = arith.select %47, %21, %52 : vector<8x8xi1>, vector<8x8xf32>
    %cst_20 = arith.constant dense<0.000000e+00> : vector<8xf32>
    %54 = vector.multi_reduction <add>, %53, %cst_20 [1] : vector<8x8xf32> to vector<8xf32>
    %55 = vector.shape_cast %54 : vector<8xf32> to vector<8x1xf32>
    %56 = arith.mulf %51, %55 : vector<8x1xf32>
    %c0_21 = arith.constant 0 : index
    %c0_22 = arith.constant 0 : index
    %57 = vector.load %arg5[%c0_21, %c0_22] : memref<1x1xf32, #tpu.memory_space<vmem>>, vector<1x1xf32>
    %cst_23 = arith.constant 0.000000e+00 : f32
    %58 = vector.broadcast %cst_23 : f32 to vector<8x1xf32>
    %59 = arith.select %11, %27, %58 : vector<8x1xi1>, vector<8x1xf32>
    %60 = vector.shape_cast %59 : vector<8x1xf32> to vector<1x8x1xf32>
    %cst_24 = arith.constant dense<0.000000e+00> : vector<1xf32>
    %61 = vector.multi_reduction <add>, %60, %cst_24 [1, 2] : vector<1x8x1xf32> to vector<1xf32>
    %62 = vector.shape_cast %61 : vector<1xf32> to vector<1x1x1xf32>
    %63 = vector.extract %62[0, 0, 0] : f32 from vector<1x1x1xf32>
    %64 = vector.broadcast %63 : f32 to vector<1x1xf32>
    %65 = arith.addf %57, %64 : vector<1x1xf32>
    %c0_25 = arith.constant 0 : index
    %c0_26 = arith.constant 0 : index
    %66 = vector.load %arg5[%c0_25, %c0_26] : memref<1x1xf32, #tpu.memory_space<vmem>>, vector<1x1xf32>
    tpu.vector_store %arg5[%c0_25, %c0_26], %65 {strides = array<i32>} : memref<1x1xf32, #tpu.memory_space<vmem>>, vector<1x1xf32>,
    %c0_27 = arith.constant 0 : index
    %c0_28 = arith.constant 0 : index
    %67 = vector.load %arg6[%c0_27, %c0_28] : memref<1x1xf32, #tpu.memory_space<vmem>>, vector<1x1xf32>
    %cst_29 = arith.constant 0.000000e+00 : f32
    %68 = vector.broadcast %cst_29 : f32 to vector<8x1xf32>
    %69 = arith.select %11, %56, %68 : vector<8x1xi1>, vector<8x1xf32>
    %70 = vector.shape_cast %69 : vector<8x1xf32> to vector<1x8x1xf32>
    %cst_30 = arith.constant dense<0.000000e+00> : vector<1xf32>
    %71 = vector.multi_reduction <add>, %70, %cst_30 [1, 2] : vector<1x8x1xf32> to vector<1xf32>
    %72 = vector.shape_cast %71 : vector<1xf32> to vector<1x1x1xf32>
    %73 = vector.extract %72[0, 0, 0] : f32 from vector<1x1x1xf32>
    %74 = vector.broadcast %73 : f32 to vector<1x1xf32>
    %75 = arith.addf %67, %74 : vector<1x1xf32>
    %c0_31 = arith.constant 0 : index
    %c0_32 = arith.constant 0 : index
    %76 = vector.load %arg6[%c0_31, %c0_32] : memref<1x1xf32, #tpu.memory_space<vmem>>, vector<1x1xf32>
    tpu.vector_store %arg6[%c0_31, %c0_32], %75 {strides = array<i32>} : memref<1x1xf32, #tpu.memory_space<vmem>>, vector<1x1xf32>,
    %c0_33 = arith.constant 0 : index
    %c0_34 = arith.constant 0 : index
    %77 = vector.load %arg7[%c0_33, %c0_34] : memref<1x1xf32, #tpu.memory_space<vmem>>, vector<1x1xf32>
    %cst_35 = arith.constant 0.000000e+00 : f32
    %78 = vector.broadcast %cst_35 : f32 to vector<8x1xf32>
    %79 = arith.select %11, %55, %78 : vector<8x1xi1>, vector<8x1xf32>
    %80 = vector.shape_cast %79 : vector<8x1xf32> to vector<1x8x1xf32>
    %cst_36 = arith.constant dense<0.000000e+00> : vector<1xf32>
    %81 = vector.multi_reduction <add>, %80, %cst_36 [1, 2] : vector<1x8x1xf32> to vector<1xf32>
    %82 = vector.shape_cast %81 : vector<1xf32> to vector<1x1x1xf32>
    %83 = vector.extract %82[0, 0, 0] : f32 from vector<1x1x1xf32>
    %84 = vector.broadcast %83 : f32 to vector<1x1xf32>
    %85 = arith.addf %77, %84 : vector<1x1xf32>
    %c0_37 = arith.constant 0 : index
    %c0_38 = arith.constant 0 : index
    %86 = vector.load %arg7[%c0_37, %c0_38] : memref<1x1xf32, #tpu.memory_space<vmem>>, vector<1x1xf32>
    tpu.vector_store %arg7[%c0_37, %c0_38], %85 {strides = array<i32>} : memref<1x1xf32, #tpu.memory_space<vmem>>, vector<1x1xf32>,
    %c0_i32_39 = arith.constant 0 : i32
    %87 = arith.cmpi eq, %arg0, %c0_i32_39 : i32
    %88 = arith.extui %87 : i1 to i32
    %c0_i32_40 = arith.constant 0 : i32
    %89 = arith.cmpi ne, %88, %c0_i32_40 : i32
    scf.if %89 {
      %c0_41 = arith.constant 0 : index
      %c0_42 = arith.constant 0 : index
      %90 = vector.load %arg5[%c0_41, %c0_42] : memref<1x1xf32, #tpu.memory_space<vmem>>, vector<1x1xf32>
      %cst_43 = arith.constant 0.000000e+00 : f32
      %91 = vector.broadcast %cst_43 : f32 to vector<1x1xf32>
      %92 = arith.subf %91, %90 : vector<1x1xf32>
      %cst_44 = arith.constant 1.250000e-01 : f32
      %93 = vector.broadcast %cst_44 : f32 to vector<1x1xf32>
      %94 = arith.mulf %92, %93 : vector<1x1xf32>
      %c0_45 = arith.constant 0 : index
      %c0_46 = arith.constant 0 : index
      %95 = vector.load %arg6[%c0_45, %c0_46] : memref<1x1xf32, #tpu.memory_space<vmem>>, vector<1x1xf32>
      %c0_47 = arith.constant 0 : index
      %c0_48 = arith.constant 0 : index
      %96 = vector.load %arg7[%c0_47, %c0_48] : memref<1x1xf32, #tpu.memory_space<vmem>>, vector<1x1xf32>
      %cst_49 = arith.constant 9.99999993E-9 : f32
      %97 = vector.broadcast %cst_49 : f32 to vector<1x1xf32>
      %98 = arith.addf %96, %97 : vector<1x1xf32>
      %99 = arith.divf %95, %98 : vector<1x1xf32>
      %100 = arith.addf %94, %99 : vector<1x1xf32>
      %c0_50 = arith.constant 0 : index
      %c0_51 = arith.constant 0 : index
      %101 = vector.load %arg4[%c0_50, %c0_51] : memref<1x1xf32, #tpu.memory_space<vmem>>, vector<1x1xf32>
      tpu.vector_store %arg4[%c0_50, %c0_51], %100 {strides = array<i32>} : memref<1x1xf32, #tpu.memory_space<vmem>>, vector<1x1xf32>,
    } else {
    }
    return
  }
  func.func @transform_0(%arg0: i32) -> (i32, i32) {
    %c0_i32 = arith.constant 0 : i32
    %c0_i32_0 = arith.constant 0 : i32
    return %arg0, %c0_i32 : i32, i32
  }
  func.func @transform_1(%arg0: i32) -> (i32, i32) {
    %c0_i32 = arith.constant 0 : i32
    %c0_i32_0 = arith.constant 0 : i32
    return %arg0, %c0_i32 : i32, i32
  }
  func.func @transform_2(%arg0: i32) -> (i32, i32) {
    %c0_i32 = arith.constant 0 : i32
    %c0_i32_0 = arith.constant 0 : i32
    return %arg0, %c0_i32 : i32, i32
  }
  func.func @transform_3(%arg0: i32) -> (i32, i32) {
    %c0_i32 = arith.constant 0 : i32
    %c0_i32_0 = arith.constant 0 : i32
    %c0_i32_1 = arith.constant 0 : i32
    return %c0_i32, %c0_i32_0 : i32, i32
  }
}

</mosaic_0001>

<bundles_post_ra>
// kernel: tpu_custom_call.1
= control target key start
LH: loop header
LB: loop body
LE: loop exit
PB: predicated region body
PF: predicated region fallthrough
CT: control target
= control target key end

     0   :  { %8 = vsyncpa [#allocation6], 0  ;;  %s270_s0 = inlined_call_operand.vmem [shape: f32[8,8], index: 0, kind: input, shape index: {}]   ;;  %s271_s1 = inlined_call_operand.hbm [shape: f32[8,8], index: 1, kind: input, shape index: {}]   ;;  %s272_s2 = inlined_call_operand.vmem [shape: s32[8,1], index: 2, kind: input, shape index: {}]   ;;  %s273_s3 = inlined_call_operand.hbm [shape: f32[1,1], index: 3, kind: output, shape index: {}]  }
   0x1   :  { %9 = vsyncpa [#allocation7], 0  ;;  %s227_s12 = smov [#allocation5]  }
   0x2   :  { %s18_s13 = sshll.u32 %s227_s12, 4  ;;  %s19_s13 = int_to_ptr.vmem [resolvable:$true] %s18_s13 }
   0x3   :  { %s191_s14 = scalar_lea.vmem %s19_s13, 128  ;;  %p196_p1 = scmp.lt.s32.totalorder %s19_s13, %s19_s13 }
   0x4   :  { %p192_p0 = scmp.ne.s32.totalorder %s19_s13, %s191_s14  ;;  %p197_p2 = scmp.lt.s32.totalorder %s191_s14, %s191_s14 }
   0x6   :  { %p198_p3 = por %p197_p2, %p196_p1 }
   0x8   :  { %p199_p4 = pnand %p198_p3, %p192_p0 }
   0xa   :  { %202 = shalt.err (!%p199_p4)
}
   0xb   :  { %21 = dma.hbm_to_vmem [thread:$0]  %s271_s1, 128, %s19_s13, [#allocation6]  }
   0xc   :  { %223 = dma.done.wait [#allocation6], 128  }
   0xd   :  { %224 = vsyncadd [#allocation6], 4294967168  ;;  %v228_v0 = vmov 0   ;;  %v36_v1 = vld [vmem:[%s272_s2] sm:$0xff]  ;;  %v37_v16 = vlaneseq  ;;  %vm59_vm4 = vcmask 64512   ;;  %vm91_vm7 = vcmask 7168  }
   0xe   :  { %176 = vset.pattern.permute.xlu0 %v228_v0  ;;  %v63_v2 = vadd.s32 1, %v36_v1  ;;  %v45_v10 = vld [vmem:[#allocation5] sm:$0xff]  ;;  %vm31_vm8 = vcmask 0   ;;  %v229_v35 = vmov 0.0   ;;  %s230_s21 = smov [#allocation8]  }
   0xf   :  { %v46_v11 = vsub.f32 0.0, %v45_v10  ;;  %v38_v17 = vand.u32 127, %v37_v16  ;;  %v35_v18 = vld [vmem:[%s270_s0] sm:$0xff]  ;;  %32 = vst.msk [vmem:[#allocation2] sm:$0x1] %vm31_vm8, %v229_v35  ;;  %s155_s22 = sshll.u32 %s230_s21, 4  ;;  %s156_s22 = int_to_ptr.vmem [resolvable:$true] %s155_s22 }
  0x10   :  { %v65_v3 = vsub.s32 0, %v63_v2  ;;  %vm64_vm0 = vcmp.lt.s32.totalorder %v63_v2, 0  ;;  %33 = vst.msk [vmem:[#allocation3] sm:$0x1] %vm31_vm8, %v229_v35  ;;  %34 = vst.msk [vmem:[#allocation4] sm:$0x1] %vm31_vm8, %v229_v35  ;;  %p208_p6 = scmp.lt.s32.totalorder %s156_s22, %s156_s22 }
  0x11   :  { %v164_v12 = vmul.f32 -2.0, %v46_v11  ;;  %s203_s23 = scalar_lea.vmem %s156_s22, 16  ;;  %s207_s24 = scalar_lea.vmem %s156_s22, 32 }
  0x12   :  { %v165_v4 = vmin.u32 %v65_v3, %v63_v2  ;;  %p204_p5 = scmp.ne.s32.totalorder %s156_s22, %s203_s23  ;;  %p209_p7 = scmp.lt.s32.totalorder %s207_s24, %s203_s23 }
  0x13   :  { %v49_v13 = vmul.f32 1.442695, %v164_v12 }
  0x14   :  { %v68_v5 = vand.u32 7, %v165_v4  ;;  %p210_p8 = por %p209_p7, %p208_p6 }
  0x15   :  { %177 = vpow2.f32 %v49_v13 }
  0x16   :  { %v69_v6 = vsub.s32 0, %v68_v5  ;;  %v89_v57 = vld [vmem:[#allocation2] sm:$0x1]  ;;  %p211_p9 = pnand %p210_p8, %p204_p5 }
  0x17   :  { %v106_v60 = vld [vmem:[#allocation3] sm:$0x1]  ;;  %v121_v63 = vld [vmem:[#allocation4] sm:$0x1] }
  0x18   :  { %v70_v7 = vsel %vm64_vm0, %v69_v6, %v68_v5 }
  0x19   :  { %vm71_vm1 = vcmp.ne.s32.totalorder %v70_v7, 0  ;;  %vm72_vm2 = vcmp.lt.s32.totalorder %v70_v7, 0  ;;  %v74_v8 = vadd.s32 8, %v70_v7 }
  0x1a   :  { %vm73_vm3 = vmand %vm72_vm2, %vm71_vm1 }
  0x1b   :  { %v75_v9 = vsel %vm73_vm3, %v74_v8, %v70_v7 }
  0x1c   :  { %77 = vperm.xlu0 %176, %v75_v9  }
  0x20   :  { %55 = vperm.xlu0 %176, %v36_v1  }
  0x22   :  { %v178_v14 = vpop.eup %177 }
  0x23   :  { %v51_v15 = vadd.f32 1.0, %v178_v14 }
  0x25   :  { %179 = vrcp.f32 %v51_v15 }
  0x32   :  { %v180_v20 = vpop.eup %179 }
  0x97   :  { %v78_v19 = vpop.permute.xlu0 %77 }
  0x98   :  { %vm79_vm5 = vcmp.eq.s32.totalorder %v38_v17, %v78_v19 }
  0x99   :  { %v80_v21 = vsel %vm79_vm5, %v35_v18, 0.0  ;;  %v84_v24 = vsel %vm79_vm5, %v180_v20, 0.0 }
  0x9a   :  { %v81_v22 = vsel %vm59_vm4, %v80_v21, 0.0  ;;  %v85_v26 = vsel %vm59_vm4, %v84_v24, 0.0 }
  0x9b   :  { %v56_v23 = vpop.permute.xlu0 %55  ;;  %82 = vadd.xlane.f32.xlu1 %v81_v22 }
  0x9c   :  { %vm57_vm6 = vcmp.eq.s32.totalorder %v38_v17, %v56_v23 }
  0x9d   :  { %v58_v25 = vsel %vm57_vm6, %v35_v18, 0.0 }
  0x9e   :  { %v60_v27 = vsel %vm59_vm4, %v58_v25, 0.0 }
  0x9f   :  { %86 = vadd.xlane.f32.xlu1 %v85_v26  ;;  %61 = vadd.xlane.f32.xlu0 %v60_v27 }
 0x124   :  { %v83_v28 = vpop.xlane.xlu1 %82 }
 0x128   :  { %v87_v29 = vpop.xlane.xlu1 %86  ;;  %v62_v30 = vpop.xlane.xlu0 %61 }
 0x129   :  { %v88_v31 = vmul.f32 %v87_v29, %v83_v28  ;;  %v92_v32 = vsel %vm91_vm7, %v62_v30, 0.0  ;;  %v123_v34 = vsel %vm91_vm7, %v87_v29, 0.0 }
 0x12a   :  { %93 = vadd.xlane.f32.xlu1 %v92_v32 }
 0x12b   :  { %v108_v33 = vsel %vm91_vm7, %v88_v31, 0.0 }
 0x12e   :  { %109 = vadd.xlane.f32.xlu1 %v108_v33 }
 0x132   :  { %124 = vadd.xlane.f32.xlu1 %v123_v34 }
 0x1b3   :  { %v94_v36 = vpop.xlane.xlu1 %93 }
 0x1b4   :  { %v95_v37 = vrot.slane %v94_v36, 4 }
 0x1b6   :  { %v96_v38 = vadd.f32 %v95_v37, %v94_v36 }
 0x1b7   :  { %v110_v39 = vpop.xlane.xlu1 %109 }
 0x1b8   :  { %v97_v40 = vrot.slane %v96_v38, 2  ;;  %v111_v41 = vrot.slane %v110_v39, 4 }
 0x1ba   :  { %v112_v42 = vadd.f32 %v111_v41, %v110_v39  ;;  %v98_v43 = vadd.f32 %v97_v40, %v96_v38 }
 0x1bb   :  { %v125_v44 = vpop.xlane.xlu1 %124 }
 0x1bc   :  { %v113_v45 = vrot.slane %v112_v42, 2  ;;  %v126_v46 = vrot.slane %v125_v44, 4  ;;  %v99_v47 = vrot.slane %v98_v43, 1 }
 0x1be   :  { %v127_v48 = vadd.f32 %v126_v46, %v125_v44  ;;  %v100_v49 = vadd.f32 %v99_v47, %v98_v43  ;;  %v114_v50 = vadd.f32 %v113_v45, %v112_v42 }
 0x1c0   :  { %v128_v51 = vrot.slane %v127_v48, 2  ;;  %166 = vpush %v100_v49  ;;  %v115_v52 = vrot.slane %v114_v50, 1 }
 0x1c2   :  { %v129_v53 = vadd.f32 %v128_v51, %v127_v48  ;;  %v116_v54 = vadd.f32 %v115_v52, %v114_v50 }
 0x1c4   :  { %168 = vpush %v116_v54  ;;  %v130_v55 = vrot.slane %v129_v53, 1 }
 0x1c6   :  { %v131_v56 = vadd.f32 %v130_v55, %v129_v53 }
 0x1c8   :  { %170 = vpush %v131_v56 }
 0x1f1   :  { %s167_s0 = spop %166 }
 0x1f2   :  { %v102_v58 = vstv %s167_s0 }
 0x1f3   :  { %v103_v59 = vadd.f32 %v102_v58, %v89_v57 }
 0x1f5   :  { %105 = vst.msk [vmem:[#allocation2] sm:$0x1] %vm31_vm8, %v103_v59  ;;  %s169_s19 = spop %168 }
 0x1f6   :  { %v118_v61 = vstv %s169_s19 }
 0x1f7   :  { %v119_v62 = vadd.f32 %v118_v61, %v106_v60 }
 0x1f9   :  { %120 = vst.msk [vmem:[#allocation3] sm:$0x1] %vm31_vm8, %v119_v62  ;;  %s171_s20 = spop %170 }
 0x1fa   :  { %v133_v0 = vstv %s171_s20 }
 0x1fb   :  { %v134_v1 = vadd.f32 %v133_v0, %v121_v63 }
 0x1fc   :  { %v139_v4 = vld [vmem:[#allocation2] sm:$0x1] }
 0x1fd   :  { %135 = vst.msk [vmem:[#allocation4] sm:$0x1] %vm31_vm8, %v134_v1  ;;  %v140_v5 = vsub.f32 0.0, %v139_v4 }
 0x1ff   :  { %v141_v8 = vmul.f32 0.125, %v140_v5 }
 0x200   :  { %v142_v7 = vld [vmem:[#allocation3] sm:$0x1] }
 0x204   :  { %v143_v2 = vld [vmem:[#allocation4] sm:$0x1] }
 0x205   :  { %v144_v3 = vadd.f32 1e-08, %v143_v2 }
 0x207   :  { %181 = vrcp.f32 %v144_v3 }
 0x214   :  { %v182_v6 = vpop.eup %181 }
 0x215   :  { %v146_v9 = vmul.f32 %v182_v6, %v142_v7 }
 0x217   :  { %v147_v10 = vadd.f32 %v146_v9, %v141_v8 }
 0x219   :  { %148 = vst.msk [vmem:[#allocation8] sm:$0x1] %vm31_vm8, %v147_v10 }
 0x21a   :  { %214 = shalt.err (!%p211_p9)
}
 0x21b   :  { %158 = dma.vmem_to_hbm [thread:$0]  %s156_s22, 16, %s273_s3, [#allocation7]  }
 0x21c   :  { %225 = dma.done.wait [#allocation7], 16  }
 0x21d   :  { %226 = vsyncadd [#allocation7], 4294967280 }
 0x21e   :  { %162 = vsyncpa [#allocation6], 1 }
 0x21f   :  { %163 = vsyncpa [#allocation7], 1 }

</bundles_post_ra>
